<compile_context>
chip_gen: v6e
topology: v6e:2x2x1
jax: 0.10.0
libtpu: 0.0.40
codegen_flags: <defaults>
</compile_context>

<pallas_src>
import functools

import jax
import jax.numpy as jnp
from jax.experimental import pallas as pl
from jax.experimental.pallas import tpu as pltpu


MAX_TILE_N = 2048  # VMEM safety cap (intermediates are lane-padded to 128)


def _round_up(v, m):
    return ((v + m - 1) // m) * m


def _joint_ae_kernel(x_ref, w_ref, p_ref, out_ref, *,
                     input_dim, latent_dim, hidden_dim, w_offs):
    f32 = jnp.float32
    fused_w = hidden_dim + latent_dim + hidden_dim  # [d_pre | z | t_pre]

    def mm(a, w):
        # bf16 MXU inputs, f32 accumulation.
        return jnp.dot(a.astype(jnp.bfloat16), w, preferred_element_type=f32)

    # ---- bf16 weight slab: static-slice views (row offsets are multiples of 16) ----
    o_ew1, o_ew2, o_big, o_dw2, o_dw3 = w_offs
    ew1 = w_ref[o_ew1:o_ew1 + input_dim, :hidden_dim]
    ew2 = w_ref[o_ew2:o_ew2 + hidden_dim, :hidden_dim]
    w_big = w_ref[o_big:o_big + hidden_dim, :fused_w]
    dw2 = w_ref[o_dw2:o_dw2 + hidden_dim, :hidden_dim]
    dw3 = w_ref[o_dw3:o_dw3 + hidden_dim, :input_dim]

    # ---- small f32 params: one (8, 128) slab ----
    eb1 = p_ref[0:1, :hidden_dim]
    eb2 = p_ref[1:2, :hidden_dim]
    b_big = p_ref[2:3, :fused_w]
    db2 = p_ref[3:4, :hidden_dim]
    db3 = p_ref[4:5, :input_dim]
    tb2 = p_ref[5:6, 0:1]
    tw2_row = p_ref[6:7, :fused_w]   # zeros except lanes [hidden+latent, hidden+latent+hidden)

    x = x_ref[...].astype(f32)       # cast once, after the DMA

    # ---- encoder layers 1-2 ----
    h = jnp.maximum(mm(x, ew1) + eb1, 0.0)
    h = jnp.maximum(mm(h, ew2) + eb2, 0.0)

    # ---- fused encoder-3 + decoder-1 + treatment-1 (single MXU pass) ----
    fused = mm(h, w_big) + b_big                       # (TILE_N, fused_w)
    z = fused[:, hidden_dim:hidden_dim + latent_dim]   # = h @ ew3 + eb3
    rf = jnp.maximum(fused, 0.0)

    # treatment output: VPU multiply against zero-padded tw2 row + lane reduce
    tau = jnp.sum(rf * tw2_row, axis=-1, keepdims=True) + tb2

    # decoder tail (decoder branch is lane-aligned at offset 0)
    d = rf[:, :hidden_dim]
    d = jnp.maximum(mm(d, dw2) + db2, 0.0)
    x_hat = mm(d, dw3) + db3

    # ---- packed output: [x_hat | z | tau | pad] ----
    # INVARIANT: lanes >= input_dim + latent_dim + 1 are left uninitialized;
    # the wrapper never reads them.
    out_ref[:, 0:input_dim] = x_hat
    out_ref[:, input_dim:input_dim + latent_dim] = z
    out_ref[:, input_dim + latent_dim:input_dim + latent_dim + 1] = tau


def pack_params(params, *, input_dim, latent_dim, hidden_dim):
    """Pack module-faithful f32 params into two slabs (+ static weight offsets)."""
    fused_w = hidden_dim + latent_dim + hidden_dim
    assert fused_w <= 128 and input_dim <= 128 and hidden_dim <= 128 and latent_dim <= 128

    f32 = jnp.float32
    ew3 = params["ew3"].astype(f32)
    eb3 = params["eb3"].astype(f32)

    # Fold encoder layer 3 into both z-consumers (f32 at pack time).
    w_big = jnp.concatenate(
        [ew3 @ params["dw1"], ew3, ew3 @ params["tw1"]], axis=1)           # (hidden, fused_w)
    b_big = jnp.concatenate(
        [eb3 @ params["dw1"] + params["db1"], eb3,
         eb3 @ params["tw1"] + params["tb1"]], axis=1)                     # (1, fused_w)

    mats = [params["ew1"], params["ew2"], w_big, params["dw2"], params["dw3"]]
    offs, r = [], 0
    for w in mats:
        offs.append(r)
        r += _round_up(w.shape[0], 16)   # bf16 sublane packing: align row blocks to 16
    w_slab = jnp.zeros((max(r, 16), 128), jnp.bfloat16)
    for w, off in zip(mats, offs):
        w_slab = w_slab.at[off:off + w.shape[0], :w.shape[1]].set(w.astype(jnp.bfloat16))

    p_slab = jnp.zeros((8, 128), f32)
    p_slab = p_slab.at[0, :hidden_dim].set(params["eb1"][0])
    p_slab = p_slab.at[1, :hidden_dim].set(params["eb2"][0])
    p_slab = p_slab.at[2, :fused_w].set(b_big[0])
    p_slab = p_slab.at[3, :hidden_dim].set(params["db2"][0])
    p_slab = p_slab.at[4, :input_dim].set(params["db3"][0])
    p_slab = p_slab.at[5, 0].set(params["tb2"][0, 0])
    # tw2 row is placed directly over the treatment branch lanes of `fused`,
    # zeros elsewhere -> full-width multiply+reduce, no offset-40 lane slice.
    p_slab = p_slab.at[6, hidden_dim + latent_dim:fused_w].set(params["tw2"][:, 0])
    return w_slab, p_slab, tuple(offs)


def joint_autoencoder_forward(x, params, *, input_dim, latent_dim, hidden_dim,
                              tile_n=1024):
    """Mirrors JointAutoencoder.forward: returns (x_hat, z, tau_hat)."""
    w_slab, p_slab, w_offs = pack_params(params, input_dim=input_dim,
                                         latent_dim=latent_dim, hidden_dim=hidden_dim)
    out_w = _round_up(input_dim + latent_dim + 1, 8)   # packed output width (f32)

    # x.view(-1, input_dim); dtype cast happens inside the kernel (after DMA).
    x2 = x.reshape(-1, input_dim)
    n = x2.shape[0]

    # Batch tile: default 1024 (per-step overhead amortized), cap 2048 so the
    # lane-padded f32 intermediates (+ double-buffered in/out tiles) stay well
    # under the 32 MiB scoped-VMEM default on every generation (incl. v7x).
    tile_n = min(max(tile_n, 8), MAX_TILE_N)
    tile_n = min(tile_n, _round_up(n, 8))
    tile_n = max(8, (tile_n // 8) * 8)
    # Guarantee >= 2 grid steps where possible so both v7x TensorCores get work.
    if pl.cdiv(n, tile_n) < 2 and tile_n >= 16:
        tile_n = max(8, _round_up(tile_n // 2, 8))

    n_pad = pl.cdiv(n, tile_n) * tile_n
    if n_pad != n:
        x2 = jnp.pad(x2, ((0, n_pad - n), (0, 0)))

    grid = (n_pad // tile_n,)
    const2d = lambda i: (0, 0)   # slabs: fetched once, VMEM-resident

    kernel = functools.partial(_joint_ae_kernel, input_dim=input_dim,
                               latent_dim=latent_dim, hidden_dim=hidden_dim,
                               w_offs=w_offs)

    out = pl.pallas_call(
        kernel,
        out_shape=jax.ShapeDtypeStruct((n_pad, out_w), jnp.float32),
        grid=grid,
        in_specs=[pl.BlockSpec((tile_n, input_dim), lambda i: (i, 0)),
                  pl.BlockSpec(w_slab.shape, const2d),
                  pl.BlockSpec(p_slab.shape, const2d)],
        out_specs=pl.BlockSpec((tile_n, out_w), lambda i: (i, 0)),
        compiler_params=pltpu.CompilerParams(
            dimension_semantics=("parallel",)),   # v7x: both TCs split the grid
    )(x2, w_slab, p_slab)

    x_hat = out[:n, :input_dim]
    z = out[:n, input_dim:input_dim + latent_dim]
    tau_hat = out[:n, input_dim + latent_dim:input_dim + latent_dim + 1]
    return x_hat, z, tau_hat


def init_params(key, input_dim, latent_dim, hidden_dim):
    """Deterministic synthetic parameters. Weights stored (in, out); biases (1, out)."""
    def lin(k, fan_in, fan_out):
        kw, kb = jax.random.split(k)
        bound = 1.0 / jnp.sqrt(fan_in)
        w = jax.random.uniform(kw, (fan_in, fan_out), jnp.float32, -bound, bound)
        b = jax.random.uniform(kb, (1, fan_out), jnp.float32, -bound, bound)
        return w, b

    keys = jax.random.split(key, 8)
    ew1, eb1 = lin(keys[0], input_dim, hidden_dim)
    ew2, eb2 = lin(keys[1], hidden_dim, hidden_dim)
    ew3, eb3 = lin(keys[2], hidden_dim, latent_dim)
    dw1, db1 = lin(keys[3], latent_dim, hidden_dim)
    dw2, db2 = lin(keys[4], hidden_dim, hidden_dim)
    dw3, db3 = lin(keys[5], hidden_dim, input_dim)
    tw1, tb1 = lin(keys[6], latent_dim, hidden_dim)
    tw2, tb2 = lin(keys[7], hidden_dim, 1)
    return dict(
        ew1=ew1, eb1=eb1, ew2=ew2, eb2=eb2, ew3=ew3, eb3=eb3,
        dw1=dw1, db1=db1, dw2=dw2, db2=db2, dw3=dw3, db3=db3,
        tw1=tw1, tb1=tb1, tw2=tw2, tb2=tb2,
    )


def reference_forward(x, params, *, input_dim):
    """Plain-JAX reference: module-faithful (unfused) structure, bf16 MXU inputs
    with f32 accumulation (mirrors the kernel's matmul precision).  The only
    remaining deviation vs the kernel is the pack-time f32 fold of encoder
    layer 3, which only changes bf16 rounding — covered by 2e-2 tolerances."""
    x = x.astype(jnp.float32).reshape(-1, input_dim)
    relu = lambda v: jnp.maximum(v, 0.0)

    def lin(a, w, b):
        return jnp.dot(a.astype(jnp.bfloat16), w.astype(jnp.bfloat16),
                       preferred_element_type=jnp.float32) + b

    h = relu(lin(x, params["ew1"], params["eb1"]))
    h = relu(lin(h, params["ew2"], params["eb2"]))
    z = lin(h, params["ew3"], params["eb3"])
    t = relu(lin(z, params["tw1"], params["tb1"]))
    tau = lin(t, params["tw2"], params["tb2"])
    d = relu(lin(z, params["dw1"], params["db1"]))
    d = relu(lin(d, params["dw2"], params["db2"]))
    x_hat = lin(d, params["dw3"], params["db3"])
    return x_hat, z, tau


if __name__ == "__main__":
    input_dim, latent_dim, hidden_dim = 16, 8, 32

    key = jax.random.PRNGKey(0)
    k_x, k_p = jax.random.split(key)

    # x of shape (2, 4, 16, 16); forward flattens it to (128, input_dim=16)
    x = jax.random.normal(k_x, (2, 4, 16, 16), jnp.float32)
    params = init_params(k_p, input_dim, latent_dim, hidden_dim)

    # Default tile_n=1024 clamps to the 128-row batch, then halves to 64 so the
    # grid has 2 steps (exercises the pipeline / v7x megacore split).
    x_hat, z, tau_hat = joint_autoencoder_forward(
        x, params, input_dim=input_dim, latent_dim=latent_dim,
        hidden_dim=hidden_dim)
    jax.block_until_ready((x_hat, z, tau_hat))

    # correctness check against plain-JAX reference
    rx, rz, rt = reference_forward(x, params, input_dim=input_dim)
    n = 2 * 4 * 16
    assert x_hat.shape == (n, input_dim)
    assert z.shape == (n, latent_dim)
    assert tau_hat.shape == (n, 1)
    assert jnp.allclose(x_hat, rx, atol=2e-2, rtol=2e-2)
    assert jnp.allclose(z, rz, atol=2e-2, rtol=2e-2)
    assert jnp.allclose(tau_hat, rt, atol=2e-2, rtol=2e-2)

    print("KERNEL_OK")
</pallas_src>

<mosaic_0001>
module attributes {stable_mosaic.version = 11 : i64} {
  func.func @_joint_ae_kernel(%arg0: i32, %arg1: memref<64x16xf32, #tpu.memory_space<vmem>>, %arg2: memref<144x128xbf16, #tpu.memory_space<vmem>>, %arg3: memref<8x128xf32, #tpu.memory_space<vmem>>, %arg4: memref<64x32xf32, #tpu.memory_space<vmem>>) attributes {dimension_semantics = [#tpu.dimension_semantics<parallel>], iteration_bounds = array<i64: 2>, scalar_prefetch = 0 : i64, scratch_operands = 0 : i64, tpu.core_type = #tpu.core_type<tc>, window_params = [{transform_indices = @transform_0, window_bounds = array<i64: 64, 16>}, {pipeline_mode = #tpu.pipeline_mode<synchronous>, transform_indices = @transform_1, window_bounds = array<i64: 144, 128>}, {pipeline_mode = #tpu.pipeline_mode<synchronous>, transform_indices = @transform_2, window_bounds = array<i64: 8, 128>}, {transform_indices = @transform_3, window_bounds = array<i64: 64, 32>}]} {
    %c0 = arith.constant 0 : index
    %c0_0 = arith.constant 0 : index
    %0 = vector.load %arg2[%c0, %c0_0] : memref<144x128xbf16, #tpu.memory_space<vmem>>, vector<16x32xbf16>
    %c16 = arith.constant 16 : index
    %c0_1 = arith.constant 0 : index
    %1 = vector.load %arg2[%c16, %c0_1] : memref<144x128xbf16, #tpu.memory_space<vmem>>, vector<32x32xbf16>
    %c48 = arith.constant 48 : index
    %c0_2 = arith.constant 0 : index
    %2 = vector.load %arg2[%c48, %c0_2] : memref<144x128xbf16, #tpu.memory_space<vmem>>, vector<32x72xbf16>
    %c80 = arith.constant 80 : index
    %c0_3 = arith.constant 0 : index
    %3 = vector.load %arg2[%c80, %c0_3] : memref<144x128xbf16, #tpu.memory_space<vmem>>, vector<32x32xbf16>
    %c112 = arith.constant 112 : index
    %c0_4 = arith.constant 0 : index
    %4 = vector.load %arg2[%c112, %c0_4] : memref<144x128xbf16, #tpu.memory_space<vmem>>, vector<32x16xbf16>
    %c0_5 = arith.constant 0 : index
    %c0_6 = arith.constant 0 : index
    %5 = vector.load %arg3[%c0_5, %c0_6] : memref<8x128xf32, #tpu.memory_space<vmem>>, vector<1x32xf32>
    %c1 = arith.constant 1 : index
    %c0_7 = arith.constant 0 : index
    %6 = vector.load %arg3[%c1, %c0_7] : memref<8x128xf32, #tpu.memory_space<vmem>>, vector<1x32xf32>
    %c2 = arith.constant 2 : index
    %c0_8 = arith.constant 0 : index
    %7 = vector.load %arg3[%c2, %c0_8] : memref<8x128xf32, #tpu.memory_space<vmem>>, vector<1x72xf32>
    %c3 = arith.constant 3 : index
    %c0_9 = arith.constant 0 : index
    %8 = vector.load %arg3[%c3, %c0_9] : memref<8x128xf32, #tpu.memory_space<vmem>>, vector<1x32xf32>
    %c4 = arith.constant 4 : index
    %c0_10 = arith.constant 0 : index
    %9 = vector.load %arg3[%c4, %c0_10] : memref<8x128xf32, #tpu.memory_space<vmem>>, vector<1x16xf32>
    %c5 = arith.constant 5 : index
    %c0_11 = arith.constant 0 : index
    %10 = vector.load %arg3[%c5, %c0_11] : memref<8x128xf32, #tpu.memory_space<vmem>>, vector<1x1xf32>
    %c6 = arith.constant 6 : index
    %c0_12 = arith.constant 0 : index
    %11 = vector.load %arg3[%c6, %c0_12] : memref<8x128xf32, #tpu.memory_space<vmem>>, vector<1x72xf32>
    %c0_13 = arith.constant 0 : index
    %c0_14 = arith.constant 0 : index
    %12 = vector.load %arg1[%c0_13, %c0_14] : memref<64x16xf32, #tpu.memory_space<vmem>>, vector<64x16xf32>
    %13 = arith.truncf %12 : vector<64x16xf32> to vector<64x16xbf16>
    %cst = arith.constant dense<0.000000e+00> : vector<64x32xf32>
    %14 = tpu.matmul %13, %0, %cst {dimension_numbers = #tpu.dot_dimension_numbers<[1], [0], [0], [1], [0, 0, 1, 1], [], []>} : vector<64x16xbf16>, vector<16x32xbf16>, vector<64x32xf32> -> vector<64x32xf32>
    %15 = vector.broadcast %5 : vector<1x32xf32> to vector<64x32xf32>
    %16 = arith.addf %14, %15 : vector<64x32xf32>
    %cst_15 = arith.constant 0.000000e+00 : f32
    %17 = vector.broadcast %cst_15 : f32 to vector<64x32xf32>
    %18 = arith.maximumf %16, %17 : vector<64x32xf32>
    %19 = arith.truncf %18 : vector<64x32xf32> to vector<64x32xbf16>
    %cst_16 = arith.constant dense<0.000000e+00> : vector<64x32xf32>
    %20 = tpu.matmul %19, %1, %cst_16 {dimension_numbers = #tpu.dot_dimension_numbers<[1], [0], [0], [1], [0, 0, 1, 1], [], []>} : vector<64x32xbf16>, vector<32x32xbf16>, vector<64x32xf32> -> vector<64x32xf32>
    %21 = vector.broadcast %6 : vector<1x32xf32> to vector<64x32xf32>
    %22 = arith.addf %20, %21 : vector<64x32xf32>
    %cst_17 = arith.constant 0.000000e+00 : f32
    %23 = vector.broadcast %cst_17 : f32 to vector<64x32xf32>
    %24 = arith.maximumf %22, %23 : vector<64x32xf32>
    %25 = arith.truncf %24 : vector<64x32xf32> to vector<64x32xbf16>
    %cst_18 = arith.constant dense<0.000000e+00> : vector<64x72xf32>
    %26 = tpu.matmul %25, %2, %cst_18 {dimension_numbers = #tpu.dot_dimension_numbers<[1], [0], [0], [1], [0, 0, 1, 1], [], []>} : vector<64x32xbf16>, vector<32x72xbf16>, vector<64x72xf32> -> vector<64x72xf32>
    %27 = vector.broadcast %7 : vector<1x72xf32> to vector<64x72xf32>
    %28 = arith.addf %26, %27 : vector<64x72xf32>
    %29 = vector.extract_strided_slice %28 {offsets = [0, 32], sizes = [64, 8], strides = [1, 1]} : vector<64x72xf32> to vector<64x8xf32>
    %cst_19 = arith.constant 0.000000e+00 : f32
    %30 = vector.broadcast %cst_19 : f32 to vector<64x72xf32>
    %31 = arith.maximumf %28, %30 : vector<64x72xf32>
    %32 = vector.broadcast %11 : vector<1x72xf32> to vector<64x72xf32>
    %33 = arith.mulf %31, %32 : vector<64x72xf32>
    %cst_20 = arith.constant dense<0.000000e+00> : vector<64xf32>
    %34 = vector.multi_reduction <add>, %33, %cst_20 [1] : vector<64x72xf32> to vector<64xf32>
    %35 = vector.shape_cast %34 : vector<64xf32> to vector<64x1xf32>
    %36 = vector.broadcast %10 : vector<1x1xf32> to vector<64x1xf32>
    %37 = arith.addf %35, %36 : vector<64x1xf32>
    %38 = vector.extract_strided_slice %31 {offsets = [0, 0], sizes = [64, 32], strides = [1, 1]} : vector<64x72xf32> to vector<64x32xf32>
    %39 = arith.truncf %38 : vector<64x32xf32> to vector<64x32xbf16>
    %cst_21 = arith.constant dense<0.000000e+00> : vector<64x32xf32>
    %40 = tpu.matmul %39, %3, %cst_21 {dimension_numbers = #tpu.dot_dimension_numbers<[1], [0], [0], [1], [0, 0, 1, 1], [], []>} : vector<64x32xbf16>, vector<32x32xbf16>, vector<64x32xf32> -> vector<64x32xf32>
    %41 = vector.broadcast %8 : vector<1x32xf32> to vector<64x32xf32>
    %42 = arith.addf %40, %41 : vector<64x32xf32>
    %cst_22 = arith.constant 0.000000e+00 : f32
    %43 = vector.broadcast %cst_22 : f32 to vector<64x32xf32>
    %44 = arith.maximumf %42, %43 : vector<64x32xf32>
    %45 = arith.truncf %44 : vector<64x32xf32> to vector<64x32xbf16>
    %cst_23 = arith.constant dense<0.000000e+00> : vector<64x16xf32>
    %46 = tpu.matmul %45, %4, %cst_23 {dimension_numbers = #tpu.dot_dimension_numbers<[1], [0], [0], [1], [0, 0, 1, 1], [], []>} : vector<64x32xbf16>, vector<32x16xbf16>, vector<64x16xf32> -> vector<64x16xf32>
    %47 = vector.broadcast %9 : vector<1x16xf32> to vector<64x16xf32>
    %48 = arith.addf %46, %47 : vector<64x16xf32>
    %c0_24 = arith.constant 0 : index
    %c0_25 = arith.constant 0 : index
    %49 = vector.load %arg4[%c0_24, %c0_25] : memref<64x32xf32, #tpu.memory_space<vmem>>, vector<64x16xf32>
    tpu.vector_store %arg4[%c0_24, %c0_25], %48 {strides = array<i32>} : memref<64x32xf32, #tpu.memory_space<vmem>>, vector<64x16xf32>,
    %c0_26 = arith.constant 0 : index
    %c16_27 = arith.constant 16 : index
    %50 = vector.load %arg4[%c0_26, %c16_27] : memref<64x32xf32, #tpu.memory_space<vmem>>, vector<64x8xf32>
    tpu.vector_store %arg4[%c0_26, %c16_27], %29 {strides = array<i32>} : memref<64x32xf32, #tpu.memory_space<vmem>>, vector<64x8xf32>,
    %c0_28 = arith.constant 0 : index
    %c24 = arith.constant 24 : index
    %51 = vector.load %arg4[%c0_28, %c24] : memref<64x32xf32, #tpu.memory_space<vmem>>, vector<64x1xf32>
    tpu.vector_store %arg4[%c0_28, %c24], %37 {strides = array<i32>} : memref<64x32xf32, #tpu.memory_space<vmem>>, vector<64x1xf32>,
    return
  }
  func.func @transform_0(%arg0: i32) -> (i32, i32) {
    %c0_i32 = arith.constant 0 : i32
    %c0_i32_0 = arith.constant 0 : i32
    return %arg0, %c0_i32 : i32, i32
  }
  func.func @transform_1(%arg0: i32) -> (i32, i32) {
    %c0_i32 = arith.constant 0 : i32
    %c0_i32_0 = arith.constant 0 : i32
    %c0_i32_1 = arith.constant 0 : i32
    return %c0_i32, %c0_i32_0 : i32, i32
  }
  func.func @transform_2(%arg0: i32) -> (i32, i32) {
    %c0_i32 = arith.constant 0 : i32
    %c0_i32_0 = arith.constant 0 : i32
    %c0_i32_1 = arith.constant 0 : i32
    return %c0_i32, %c0_i32_0 : i32, i32
  }
  func.func @transform_3(%arg0: i32) -> (i32, i32) {
    %c0_i32 = arith.constant 0 : i32
    %c0_i32_0 = arith.constant 0 : i32
    return %arg0, %c0_i32 : i32, i32
  }
}

</mosaic_0001>

<bundles_post_ra>
// kernel: tpu_custom_call.1
= control target key start
LH: loop header
LB: loop body
LE: loop exit
PB: predicated region body
PF: predicated region fallthrough
CT: control target
= control target key end

     0   :  { %s1101_s12 = smov 0   ;;  %s1251_s0 = inlined_call_operand.vmem [shape: f32[128,16], index: 0, kind: input, shape index: {}]   ;;  %s1252_s1 = inlined_call_operand.vmem [shape: bf16[144,128], index: 1, kind: input, shape index: {}]   ;;  %s1253_s2 = inlined_call_operand.vmem [shape: f32[8,128], index: 2, kind: input, shape index: {}]   ;;  %s1254_s3 = inlined_call_operand.vmem [shape: f32[128,32], index: 3, kind: output, shape index: {}]  }
   0x1 LB: > { %s916_s13 = sadd.s32 4294967295, %s1077_s12   ;;  %p920_p0 = scmp.ge.s32.totalorder %s1077_s12, 1  ;;  %s1077_s12 = sphi %s1101_s12, %s13_s12  }
   0x2   : > { %p138_p1 = scmp.lt.s32.totalorder %s1077_s12, 3 }
   0x4   : > { %p139_p2 = pnand %p920_p0, %p138_p1 }
   0x5   : > { %s921_s16 = sshll.u32 (!%p139_p2), %s916_s13, 3  ;;  %s1079_s15 = smov (!%p139_p2), 112  }
   0x6   : > { %142 = sbr.rel (%p139_p2) target bundleno = 1055 (0x41f), region = 32  ;;  %p163_p3 = scmp.lt.s32.totalorder (!%p139_p2), %s921_s16, 15 }
   0x7   : > { %s1080_s24 = smov (!%p139_p2), 24  }
   0xb   : > { %v1062_v0 = vld [vmem:[%s1252_s1] sm:$0xff]   ;;  %s1256_s16 = smov (!%p163_p3, %s921_s16), 15  ;;  %vm222_vm0 = vcmask 130048   ;;  %v1063_v13 = vld [vmem:[%s1252_s1 + $0x10] sm:$0xff]   ;;  %v1064_v14 = vld [vmem:[%s1252_s1 + $0x8] sm:$0xff]   ;;  %vm328_vm1 = vcmask 261120  }
   0xc   : > { %992 = vmatprep.subr.bf16.mxu0 %v1062_v0  ;;  %1050 = vmatprep.subr.bf16.mxu1 %v1062_v0  ;;  %s922_s17 = sshll.u32 %s1256_s16, 3  ;;  %v925_v18 = vld [vmem:[%s1253_s2] ss:$0 sm:$0xff]  ;;  %v1066_v45 = vld [vmem:[%s1252_s1 + $0x18] sm:$0xff]   ;;  %v1067_v46 = vld [vmem:[%s1252_s1 + $0x30] sm:$0xff]   ;;  %vm531_vm2 = vcmask 588800  }
   0xd   : > { %993 = vmatpush3.bf16.msra.mxu0 %v1062_v0  ;;  %1051 = vmatpush3.bf16.msra.mxu1 %v1062_v0  ;;  %s166_s20 = scalar_lea.vmem %s1251_s0, %s922_s17  ;;  %v1065_v44 = vld [vmem:[%s1252_s1 + $0x20] sm:$0xff]   ;;  %s1198_s4 = scalar_lea.vmem %s1254_s3, %s922_s17  ;;  %vm810_vm3 = vcmask 195712   ;;  %vm851_vm4 = vcmask 203968  }
   0xe   : > { %v200_v1 = vld [vmem:[%s166_s20] sm:$0xff]  ;;  %v201_v2 = vld [vmem:[%s166_s20 + $0x8] sm:$0xff]  ;;  %v202_v3 = vld [vmem:[%s166_s20 + $0x10] sm:$0xff]  ;;  %1002 = vmatprep.subr.bf16.mxu1 %v1063_v13  ;;  %1014 = vmatprep.subr.bf16.mxu0 %v1065_v44 }
   0xf   : > { %v208_v4 = vpack.c.bf16 %v201_v2, %v200_v1  ;;  %v203_v5 = vld [vmem:[%s166_s20 + $0x18] sm:$0xff]  ;;  %v204_v6 = vld [vmem:[%s166_s20 + $0x20] sm:$0xff]  ;;  %v205_v7 = vld [vmem:[%s166_s20 + $0x28] sm:$0xff] }
  0x10   : > { %v209_v8 = vpack.c.bf16 %v203_v5, %v202_v3  ;;  %v210_v9 = vpack.c.bf16 %v205_v7, %v204_v6  ;;  %v206_v10 = vld [vmem:[%s166_s20 + $0x30] sm:$0xff]  ;;  %v207_v11 = vld [vmem:[%s166_s20 + $0x38] sm:$0xff]  ;;  %v931_v49 = vld [vmem:[%s1253_s2 + $0x1] ss:$0 sm:$0xff] }
  0x11   : > { %994 = vmatprep.mubr.msk.bf16.mxu0 %vm222_vm0, %v208_v4  ;;  %v211_v12 = vpack.c.bf16 %v207_v11, %v206_v10 }
  0x12   : > { %995 = vmatmul.mubr.msk.bf16.vlgmr.msra.gmra.mxu0 %vm222_vm0, %v209_v8  ;;  %998 = vmatprep.mubr.msk.bf16.mxu1 %vm222_vm0, %v210_v9 }
  0x13   : > { %999 = vmatmul.mubr.msk.bf16.vlgmr.msra.gmra.mxu1 %vm222_vm0, %v211_v12  ;;  %1015 = vmatpush3.bf16.msra.mxu0 %v1065_v44  ;;  %v1068_v12 = vld [vmem:[%s1252_s1 + $0x28] sm:$0xff]  }
  0x14   : > { %1003 = vmatpush3.bf16.msra.mxu1 %v1063_v13  ;;  %1016 = vmatprep.subr.bf16.mxu0 %v1066_v45  ;;  %v938_v13 = vld [vmem:[%s1253_s2 + $0x2] ss:$0 sm:$0xff] }
  0x15   : > { %1004 = vmatprep.subr.bf16.mxu1 %v1064_v14 }
  0x17   : > { %1017 = vmatpush3.bf16.msra.mxu0 %v1066_v45 }
  0x18   : > { %1005 = vmatpush3.bf16.msra.mxu1 %v1064_v14 }
  0x19   : > { %1026 = vmatprep.subr.bf16.mxu1 %v1067_v46 }
  0xd2   : > { %v996_v15 = vpop.f32.mrf.mxu0 }
  0xd3   : > { %v1000_v16 = vpop.f32.mrf.mxu1  ;;  %v278_v25 = vadd.f32 %v996_v15, %v925_v18 }
  0xd4   : > { %v269_v17 = vpop.f32.mrf.mxu0  ;;  %v294_v37 = vadd.f32 %v1000_v16, %v925_v18 }
  0xd5   : > { %v285_v19 = vpop.f32.mrf.mxu1  ;;  %v270_v22 = vadd.f32 %v925_v18, %v269_v17  ;;  %v302_v34 = vmax.f32 %v278_v25, 0.0  ;;  %v945_v17 = vld [vmem:[%s1253_s2 + $0x6] ss:$0 sm:$0xff] }
  0xd6   : > { %v997_v20 = vpop.f32.mrf.mxu0  ;;  %v286_v21 = vadd.f32 %v925_v18, %v285_v19  ;;  %v306_v41 = vmax.f32 %v294_v37, 0.0 }
  0xd7   : > { %v281_v23 = vadd.f32 %v997_v20, %v925_v18  ;;  %v1001_v24 = vpop.f32.mrf.mxu1  ;;  %v300_v32 = vmax.f32 %v270_v22, 0.0 }
  0xd8   : > { %v272_v26 = vpop.f32.mrf.mxu0  ;;  %v304_v30 = vmax.f32 %v286_v21, 0.0  ;;  %v297_v39 = vadd.f32 %v1001_v24, %v925_v18 }
  0xd9   : > { %v273_v27 = vadd.f32 %v925_v18, %v272_v26  ;;  %v288_v28 = vpop.f32.mrf.mxu1  ;;  %v303_v29 = vmax.f32 %v281_v23, 0.0 }
  0xda   : > { %v289_v31 = vadd.f32 %v925_v18, %v288_v28  ;;  %v307_v42 = vmax.f32 %v297_v39, 0.0 }
  0xdb   : > { %v301_v33 = vmax.f32 %v273_v27, 0.0  ;;  %v309_v38 = vpack.c.bf16 %v303_v29, %v302_v34 }
  0xdc   : > { %v305_v35 = vmax.f32 %v289_v31, 0.0  ;;  %v311_v43 = vpack.c.bf16 %v307_v42, %v306_v41 }
  0xdd   : > { %v308_v36 = vpack.c.bf16 %v301_v33, %v300_v32 }
  0xde   : > { %v310_v40 = vpack.c.bf16 %v305_v35, %v304_v30 }
  0xdf   : > { %1006 = vmatprep.mubr.msk.bf16.mxu1 %vm328_vm1, %v308_v36 }
  0xe0   : > { %1007 = vmatmul.mubr.msk.bf16.vlgmr.msra.gmra.mxu1 %vm328_vm1, %v309_v38 }
  0xe1   : > { %1010 = vmatprep.mubr.msk.bf16.mxu1 %vm328_vm1, %v310_v40  ;;  %1027 = vmatpush3.bf16.msra.mxu1 %v1067_v46 }
  0xe2   : > { %1028 = vmatprep.subr.bf16.mxu1 %v1068_v12 }
  0xe5   : > { %1029 = vmatpush3.bf16.msra.mxu1 %v1068_v12 }
  0xe8   : > { %1011 = vmatmul.mubr.msk.bf16.gmra.mxu1 %vm328_vm1, %v311_v43 }
 0x1a0   : > { %v1008_v47 = vpop.f32.mrf.mxu1 }
 0x1a1   : > { %v384_v53 = vadd.f32 %v1008_v47, %v931_v49 }
 0x1a2   : > { %v375_v48 = vpop.f32.mrf.mxu1 }
 0x1a3   : > { %v376_v51 = vadd.f32 %v931_v49, %v375_v48  ;;  %v408_v60 = vmax.f32 %v384_v53, 0.0 }
 0x1a4   : > { %v1009_v50 = vpop.f32.mrf.mxu1 }
 0x1a5   : > { %v387_v52 = vadd.f32 %v1009_v50, %v931_v49  ;;  %v406_v58 = vmax.f32 %v376_v51, 0.0 }
 0x1a6   : > { %v378_v54 = vpop.f32.mrf.mxu1 }
 0x1a7   : > { %v379_v55 = vadd.f32 %v931_v49, %v378_v54  ;;  %v409_v56 = vmax.f32 %v387_v52, 0.0 }
 0x1a8   : > { %v1012_v57 = vpop.f32.mrf.mxu1 }
 0x1a9   : > { %v407_v59 = vmax.f32 %v379_v55, 0.0  ;;  %v415_v63 = vpack.c.bf16 %v409_v56, %v408_v60  ;;  %v400_v3 = vadd.f32 %v1012_v57, %v931_v49  ;;  %v1070_v60 = vld [vmem:[%s1252_s1 + $0x38] sm:$0xff]  }
 0x1aa   : > { %v391_v61 = vpop.f32.mrf.mxu1 }
 0x1ab   : > { %v414_v62 = vpack.c.bf16 %v407_v59, %v406_v58  ;;  %v392_v1 = vadd.f32 %v931_v49, %v391_v61  ;;  %v412_v9 = vmax.f32 %v400_v3, 0.0  ;;  %v1069_v59 = vld [vmem:[%s1252_s1 + $0x40] sm:$0xff]  }
 0x1ac   : > { %v1013_v0 = vpop.f32.mrf.mxu1  ;;  %1038 = vmatprep.subr.bf16.mxu0 %v1069_v59  ;;  %v946_v61 = vld [vmem:[%s1253_s2 + $0x5] ss:$0 sm:$0xff] }
 0x1ad   : > { %v403_v2 = vadd.f32 %v1013_v0, %v931_v49  ;;  %1018 = vmatprep.mubr.msk.bf16.mxu0 %vm328_vm1, %v414_v62  ;;  %v410_v7 = vmax.f32 %v392_v1, 0.0 }
 0x1ae   : > { %v394_v4 = vpop.f32.mrf.mxu1  ;;  %1019 = vmatmul.mubr.msk.bf16.vlgmr.msra.gmra.mxu0 %vm328_vm1, %v415_v63 }
 0x1af   : > { %v395_v5 = vadd.f32 %v931_v49, %v394_v4  ;;  %v413_v6 = vmax.f32 %v403_v2, 0.0  ;;  %1039 = vmatpush3.bf16.msra.mxu0 %v1069_v59 }
 0x1b0   : > { %1040 = vmatprep.subr.bf16.mxu0 %v1070_v60 }
 0x1b1   : > { %v411_v8 = vmax.f32 %v395_v5, 0.0  ;;  %v417_v11 = vpack.c.bf16 %v413_v6, %v412_v9 }
 0x1b3   : > { %v416_v10 = vpack.c.bf16 %v411_v8, %v410_v7  ;;  %1041 = vmatpush3.bf16.msra.mxu0 %v1070_v60 }
 0x1b5   : > { %1022 = vmatprep.mubr.msk.bf16.mxu0 %vm328_vm1, %v416_v10 }
 0x1b6   : > { %1023 = vmatmul.mubr.msk.bf16.gmra.mxu0 %vm328_vm1, %v417_v11 }
 0x26e   : > { %v1020_v14 = vpop.f32.mrf.mxu0 }
 0x26f   : > { %v489_v15 = vadd.f32 %v1020_v14, %v938_v13 }
 0x270   : > { %v480_v16 = vpop.f32.mrf.mxu0 }
 0x271   : > { %v513_v18 = vmax.f32 %v489_v15, 0.0  ;;  %v481_v19 = vadd.f32 %v938_v13, %v480_v16  ;;  %v947_v16 = vld [vmem:[%s1253_s2 + $0x3] ss:$0 sm:$0xff] }
 0x272   : > { %v1021_v20 = vpop.f32.mrf.mxu0 }
 0x273   : > { %v511_v21 = vmax.f32 %v481_v19, 0.0  ;;  %v492_v22 = vadd.f32 %v1021_v20, %v938_v13  ;;  %v525_v23 = vmul.f32 %v945_v17, %v513_v18 }
 0x274   : > { %v483_v24 = vpop.f32.mrf.mxu0 }
 0x275   : > { %v514_v25 = vmax.f32 %v492_v22, 0.0  ;;  %v484_v26 = vadd.f32 %v938_v13, %v483_v24  ;;  %v538_v27 = vsel %vm531_vm2, %v525_v23, 0.0  ;;  %v523_v28 = vmul.f32 %v945_v17, %v511_v21 }
 0x276   : > { %539 = vadd.xlane.f32.xlu1 %v538_v27  ;;  %v1024_v29 = vpop.f32.mrf.mxu0 }
 0x277   : > { %v512_v30 = vmax.f32 %v484_v26, 0.0  ;;  %v532_v31 = vsel %vm531_vm2, %v523_v28, 0.0  ;;  %v505_v32 = vadd.f32 %v1024_v29, %v938_v13  ;;  %v526_v34 = vmul.f32 %v945_v17, %v514_v25 }
 0x278   : > { %v496_v33 = vpop.f32.mrf.mxu0  ;;  %533 = vadd.xlane.f32.xlu0 %v532_v31  ;;  %v569_v38 = vpack.c.bf16 %v514_v25, %v513_v18 }
 0x279   : > { %v568_v35 = vpack.c.bf16 %v512_v30, %v511_v21  ;;  %v497_v36 = vadd.f32 %v938_v13, %v496_v33  ;;  %v524_v37 = vmul.f32 %v945_v17, %v512_v30  ;;  %v541_v39 = vsel %vm531_vm2, %v526_v34, 0.0 }
 0x27a   : > { %v1025_v40 = vpop.f32.mrf.mxu0  ;;  %542 = vadd.xlane.f32.xlu1 %v541_v39  ;;  %v517_v44 = vmax.f32 %v505_v32, 0.0 }
 0x27b   : > { %v515_v41 = vmax.f32 %v497_v36, 0.0  ;;  %v508_v42 = vadd.f32 %v1025_v40, %v938_v13  ;;  %1030 = vmatprep.mubr.msk.bf16.mxu1 %vm328_vm1, %v568_v35  ;;  %v535_v43 = vsel %vm531_vm2, %v524_v37, 0.0 }
 0x27c   : > { %v499_v45 = vpop.f32.mrf.mxu0  ;;  %1031 = vmatmul.mubr.msk.bf16.vlgmr.msra.gmra.mxu1 %vm328_vm1, %v569_v38  ;;  %536 = vadd.xlane.f32.xlu0 %v535_v43  ;;  %v529_v51 = vmul.f32 %v945_v17, %v517_v44 }
 0x27d   : > { %v500_v46 = vadd.f32 %v938_v13, %v499_v45  ;;  %v527_v47 = vmul.f32 %v945_v17, %v515_v41  ;;  %v518_v48 = vmax.f32 %v508_v42, 0.0 }
 0x27e   : > { %v550_v57 = vsel %vm531_vm2, %v529_v51, 0.0 }
 0x27f   : > { %v516_v49 = vmax.f32 %v500_v46, 0.0  ;;  %v544_v50 = vsel %vm531_vm2, %v527_v47, 0.0  ;;  %v571_v54 = vpack.c.bf16 %v518_v48, %v517_v44  ;;  %v530_v56 = vmul.f32 %v945_v17, %v518_v48 }
 0x280   : > { %545 = vadd.xlane.f32.xlu0 %v544_v50 }
 0x281   : > { %v570_v52 = vpack.c.bf16 %v516_v49, %v515_v41  ;;  %v528_v53 = vmul.f32 %v945_v17, %v516_v49  ;;  %v553_v58 = vsel %vm531_vm2, %v530_v56, 0.0 }
 0x283   : > { %1034 = vmatprep.mubr.msk.bf16.mxu1 %vm328_vm1, %v570_v52  ;;  %v547_v55 = vsel %vm531_vm2, %v528_v53, 0.0  ;;  %v954_v52 = vld [vmem:[%s1253_s2 + $0x4] ss:$0 sm:$0xff] }
 0x284   : > { %548 = vadd.xlane.f32.xlu1 %v547_v55  ;;  %1035 = vmatmul.mubr.msk.bf16.gmra.mxu1 %vm328_vm1, %v571_v54 }
 0x285   : > { %551 = vadd.xlane.f32.xlu0 %v550_v57 }
 0x288   : > { %554 = vadd.xlane.f32.xlu1 %v553_v58 }
 0x299   : > { %788 = vrot.lane.b32.xlu1 %v484_v26, %s1079_s15 }
 0x29b   : > { %786 = vrot.lane.b32.xlu0 %v481_v19, %s1079_s15 }
 0x29d   : > { %790 = vrot.lane.b32.xlu1 %v489_v15, %s1079_s15 }
 0x29f   : > { %794 = vrot.lane.b32.xlu0 %v497_v36, %s1079_s15 }
 0x2a1   : > { %792 = vrot.lane.b32.xlu1 %v492_v22, %s1079_s15 }
 0x2a3   : > { %798 = vrot.lane.b32.xlu0 %v505_v32, %s1079_s15 }
 0x2a5   : > { %796 = vrot.lane.b32.xlu1 %v500_v46, %s1079_s15 }
 0x2a9   : > { %800 = vrot.lane.b32.xlu1 %v508_v42, %s1079_s15 }
 0x2ff   : > { %v540_v62 = vpop.xlane.xlu1 %539 }
 0x300   : > { %v562_v63 = vadd.f32 %v946_v61, %v540_v62 }
 0x301   : > { %v534_v0 = vpop.xlane.xlu0 %533 }
 0x302   : > { %831 = vrot.lane.b32.xlu0 %v562_v63, %s1080_s24  ;;  %v560_v1 = vadd.f32 %v946_v61, %v534_v0 }
 0x303   : > { %v543_v2 = vpop.xlane.xlu1 %542 }
 0x304   : > { %v563_v3 = vadd.f32 %v946_v61, %v543_v2 }
 0x305   : > { %v537_v4 = vpop.xlane.xlu0 %536 }
 0x306   : > { %827 = vrot.lane.b32.xlu0 %v560_v1, %s1080_s24  ;;  %833 = vrot.lane.b32.xlu1 %v563_v3, %s1080_s24  ;;  %v561_v5 = vadd.f32 %v946_v61, %v537_v4 }
 0x309   : > { %v546_v6 = vpop.xlane.xlu0 %545 }
 0x30a   : > { %v564_v7 = vadd.f32 %v946_v61, %v546_v6  ;;  %829 = vrot.lane.b32.xlu1 %v561_v5, %s1080_s24 }
 0x30c   : > { %835 = vrot.lane.b32.xlu0 %v564_v7, %s1080_s24 }
 0x30d   : > { %v549_v8 = vpop.xlane.xlu1 %548 }
 0x30e   : > { %v565_v9 = vadd.f32 %v946_v61, %v549_v8  ;;  %v552_v10 = vpop.xlane.xlu0 %551 }
 0x30f   : > { %v566_v11 = vadd.f32 %v946_v61, %v552_v10 }
 0x310   : > { %837 = vrot.lane.b32.xlu1 %v565_v9, %s1080_s24 }
 0x311   : > { %839 = vrot.lane.b32.xlu0 %v566_v11, %s1080_s24  ;;  %v555_v12 = vpop.xlane.xlu1 %554 }
 0x312   : > { %v567_v13 = vadd.f32 %v946_v61, %v555_v12  ;;  %v787_v45 = vpop.permute.xlu0 %786 }
 0x314   : > { %841 = vrot.lane.b32.xlu1 %v567_v13, %s1080_s24 }
 0x315   : > { %v789_v43 = vpop.permute.xlu1 %788 }
 0x316   : > { %v795_v47 = vpop.permute.xlu0 %794 }
 0x319   : > { %v791_v44 = vpop.permute.xlu1 %790 }
 0x31a   : > { %v799_v49 = vpop.permute.xlu0 %798 }
 0x31d   : > { %v793_v46 = vpop.permute.xlu1 %792 }
 0x321   : > { %v797_v48 = vpop.permute.xlu1 %796 }
 0x325   : > { %v801_v50 = vpop.permute.xlu1 %800 }
 0x33c   : > { %v1032_v14 = vpop.f32.mrf.mxu1 }
 0x33d   : > { %v643_v20 = vadd.f32 %v1032_v14, %v947_v16 }
 0x33e   : > { %v634_v15 = vpop.f32.mrf.mxu1 }
 0x33f   : > { %v635_v18 = vadd.f32 %v947_v16, %v634_v15  ;;  %v667_v27 = vmax.f32 %v643_v20, 0.0 }
 0x340   : > { %v1033_v17 = vpop.f32.mrf.mxu1 }
 0x341   : > { %v646_v19 = vadd.f32 %v1033_v17, %v947_v16  ;;  %v665_v25 = vmax.f32 %v635_v18, 0.0 }
 0x342   : > { %v637_v21 = vpop.f32.mrf.mxu1 }
 0x343   : > { %v638_v22 = vadd.f32 %v947_v16, %v637_v21  ;;  %v668_v23 = vmax.f32 %v646_v19, 0.0 }
 0x344   : > { %v1036_v24 = vpop.f32.mrf.mxu1 }
 0x345   : > { %v666_v26 = vmax.f32 %v638_v22, 0.0  ;;  %v674_v30 = vpack.c.bf16 %v668_v23, %v667_v27  ;;  %v659_v34 = vadd.f32 %v1036_v24, %v947_v16 }
 0x346   : > { %v650_v28 = vpop.f32.mrf.mxu1 }
 0x347   : > { %v673_v29 = vpack.c.bf16 %v666_v26, %v665_v25  ;;  %v651_v32 = vadd.f32 %v947_v16, %v650_v28  ;;  %v671_v40 = vmax.f32 %v659_v34, 0.0 }
 0x348   : > { %v1037_v31 = vpop.f32.mrf.mxu1 }
 0x349   : > { %v662_v33 = vadd.f32 %v1037_v31, %v947_v16  ;;  %1042 = vmatprep.mubr.msk.bf16.mxu0 %vm328_vm1, %v673_v29  ;;  %v669_v38 = vmax.f32 %v651_v32, 0.0 }
 0x34a   : > { %v653_v35 = vpop.f32.mrf.mxu1  ;;  %1043 = vmatmul.mubr.msk.bf16.vlgmr.msra.gmra.mxu0 %vm328_vm1, %v674_v30 }
 0x34b   : > { %v654_v36 = vadd.f32 %v947_v16, %v653_v35  ;;  %v672_v37 = vmax.f32 %v662_v33, 0.0 }
 0x34d   : > { %v670_v39 = vmax.f32 %v654_v36, 0.0  ;;  %v676_v42 = vpack.c.bf16 %v672_v37, %v671_v40 }
 0x34f   : > { %v675_v41 = vpack.c.bf16 %v670_v39, %v669_v38 }
 0x351   : > { %1046 = vmatprep.mubr.msk.bf16.mxu0 %vm328_vm1, %v675_v41 }
 0x352   : > { %1047 = vmatmul.mubr.msk.bf16.gmra.mxu0 %vm328_vm1, %v676_v42 }
 0x374   : > { %v832_v51 = vpop.permute.xlu0 %831 }
 0x378   : > { %v834_v53 = vpop.permute.xlu1 %833  ;;  %v828_v56 = vpop.permute.xlu0 %827 }
 0x37c   : > { %v830_v60 = vpop.permute.xlu1 %829 }
 0x37e   : > { %v836_v62 = vpop.permute.xlu0 %835 }
 0x382   : > { %v838_v3 = vpop.permute.xlu1 %837 }
 0x383   : > { %v840_v6 = vpop.permute.xlu0 %839 }
 0x386   : > { %v842_v11 = vpop.permute.xlu1 %841 }
 0x40a   : > { %v1044_v54 = vpop.f32.mrf.mxu0 }
 0x40b   : > { %v748_v55 = vadd.f32 %v1044_v54, %v954_v52 }
 0x40c   : > { %v739_v57 = vpop.f32.mrf.mxu0 }
 0x40d   : > { %772 = vst.msk [vmem:[%s1198_s4 + $0x10] sm:$0xff] %vm222_vm0, %v748_v55  ;;  %v740_v58 = vadd.f32 %v954_v52, %v739_v57 }
 0x40e   : > { %813 = vst.msk [vmem:[%s1198_s4 + $0x10] sm:$0xff] %vm810_vm3, %v791_v44  ;;  %v1045_v59 = vpop.f32.mrf.mxu0 }
 0x40f   : > { %854 = vst.msk [vmem:[%s1198_s4 + $0x10] sm:$0xff] %vm851_vm4, %v832_v51  ;;  %v751_v61 = vadd.f32 %v1045_v59, %v954_v52 }
 0x410   : > { %770 = vst.msk [vmem:[%s1198_s4] sm:$0xff] %vm222_vm0, %v740_v58  ;;  %v742_v63 = vpop.f32.mrf.mxu0 }
 0x411   : > { %811 = vst.msk [vmem:[%s1198_s4] sm:$0xff] %vm810_vm3, %v787_v45  ;;  %v743_v0 = vadd.f32 %v954_v52, %v742_v63 }
 0x412   : > { %852 = vst.msk [vmem:[%s1198_s4] sm:$0xff] %vm851_vm4, %v828_v56  ;;  %v1048_v1 = vpop.f32.mrf.mxu0 }
 0x413   : > { %773 = vst.msk [vmem:[%s1198_s4 + $0x18] sm:$0xff] %vm222_vm0, %v751_v61  ;;  %771 = vst.msk [vmem:[%s1198_s4 + $0x8] sm:$0xff] %vm222_vm0, %v743_v0  ;;  %v764_v2 = vadd.f32 %v1048_v1, %v954_v52 }
 0x414   : > { %814 = vst.msk [vmem:[%s1198_s4 + $0x18] sm:$0xff] %vm810_vm3, %v793_v46  ;;  %812 = vst.msk [vmem:[%s1198_s4 + $0x8] sm:$0xff] %vm810_vm3, %v789_v43  ;;  %v755_v4 = vpop.f32.mrf.mxu0 }
 0x415   : > { %855 = vst.msk [vmem:[%s1198_s4 + $0x18] sm:$0xff] %vm851_vm4, %v834_v53  ;;  %853 = vst.msk [vmem:[%s1198_s4 + $0x8] sm:$0xff] %vm851_vm4, %v830_v60  ;;  %v756_v5 = vadd.f32 %v954_v52, %v755_v4 }
 0x416   : > { %776 = vst.msk [vmem:[%s1198_s4 + $0x30] sm:$0xff] %vm222_vm0, %v764_v2  ;;  %v1049_v7 = vpop.f32.mrf.mxu0 }
 0x417   : > { %817 = vst.msk [vmem:[%s1198_s4 + $0x30] sm:$0xff] %vm810_vm3, %v799_v49  ;;  %v767_v8 = vadd.f32 %v1049_v7, %v954_v52 }
 0x418   : > { %858 = vst.msk [vmem:[%s1198_s4 + $0x30] sm:$0xff] %vm851_vm4, %v840_v6  ;;  %v758_v9 = vpop.f32.mrf.mxu0 }
 0x419   : > { %774 = vst.msk [vmem:[%s1198_s4 + $0x20] sm:$0xff] %vm222_vm0, %v756_v5  ;;  %777 = vst.msk [vmem:[%s1198_s4 + $0x38] sm:$0xff] %vm222_vm0, %v767_v8  ;;  %v759_v10 = vadd.f32 %v954_v52, %v758_v9 }
 0x41a   : > { %815 = vst.msk [vmem:[%s1198_s4 + $0x20] sm:$0xff] %vm810_vm3, %v795_v47  ;;  %818 = vst.msk [vmem:[%s1198_s4 + $0x38] sm:$0xff] %vm810_vm3, %v801_v50 }
 0x41b   : > { %856 = vst.msk [vmem:[%s1198_s4 + $0x20] sm:$0xff] %vm851_vm4, %v836_v62  ;;  %859 = vst.msk [vmem:[%s1198_s4 + $0x38] sm:$0xff] %vm851_vm4, %v842_v11 }
 0x41c   : > { %775 = vst.msk [vmem:[%s1198_s4 + $0x28] sm:$0xff] %vm222_vm0, %v759_v10 }
 0x41d   : > { %816 = vst.msk [vmem:[%s1198_s4 + $0x28] sm:$0xff] %vm810_vm3, %v797_v48 }
 0x41e   : > { %857 = vst.msk [vmem:[%s1198_s4 + $0x28] sm:$0xff] %vm851_vm4, %v838_v3 }
 0x41f PF: > { %s13_s12 = sadd.s32 1, %s1077_s12  }
 0x420   : > { %p10_p4 = scmp.ge.s32.totalorder %s13_s12, 4  }
 0x422   :  { %12 = sbr.rel (!%p10_p4) target bundleno = 1 (0x1), region = 62 }

</bundles_post_ra>
